<compile_context>
chip_gen: v7x
topology: tpu7x:2x2x1
jax: 0.10.0
libtpu: 0.0.40
codegen_flags: <defaults>
</compile_context>

<pallas_src>
import jax
import jax.numpy as jnp
from jax import lax
from jax.experimental import pallas as pl
from jax.experimental.pallas import tpu as pltpu

_SUB = 8                              # f32 sublanes per vreg
_LANES = 128                          # lanes per vreg
_CHUNK = 32                           # inner-loop rows: multiple of bf16(16)/int8(32) packing
_MAX_TS = 2048                        # hard cap on spatial-tile rows
_STREAM_BUDGET = 8 * 1024 * 1024      # double-buffered streamed input bytes per grid step


def _round_up(a: int, b: int) -> int:
    return -(-a // b) * b


def _round_down(a: int, b: int) -> int:
    return (a // b) * b


def _make_wxent_kernel(num_classes, ts, chunk, n_chunks, n_inner, valid_rows):
    """Builds the kernel body as a closure over the static tiling configuration."""

    def _chunk_loss(w_ref, pred_ref, lbl_ref, r0, row_base):
        """(chunk, 128) weighted XE for rows [r0, r0+chunk) of the current tile.

        Rows past the true spatial extent (partial tail tile) and pixels with the -1
        padding label contribute exactly 0.
        """
        lbl = lbl_ref[0, pl.ds(r0, chunk), :].astype(jnp.int32)

        def xc(c):
            return pred_ref[0, c, pl.ds(r0, chunk), :].astype(jnp.float32)

        # Pass 1: channel max (C-1 elementwise vmax over full vregs).
        # TODO(synk): for very large class counts (C >> 16) switch these unrolled channel
        # loops to a lax.fori_loop with a dynamic channel index to bound code size.
        m = xc(0)
        for c in range(1, num_classes):
            m = jnp.maximum(m, xc(c))

        # Pass 2: exp-sum (EUP) + gather true-class logit / weight via label==c masks.
        esum = jnp.zeros_like(m)
        x_true = jnp.zeros_like(m)
        w_true = jnp.zeros_like(m)
        for c in range(num_classes):
            v = xc(c)
            esum = esum + jnp.exp(v - m)
            sel = lbl == c
            x_true = jnp.where(sel, v, x_true)
            w_true = jnp.where(sel, w_ref[c], w_true)

        # Weighted XE per pixel: w_y * (logsumexp(x) - x_y).  No divide needed.
        lse = m + jnp.log(esum)
        rows = row_base + r0 + lax.broadcasted_iota(jnp.int32, (chunk, _LANES), 0)
        valid = (rows < valid_rows) & (lbl >= 0)
        return jnp.where(valid, w_true * (lse - x_true), 0.0)

    def kernel(w_ref, pred_ref, lbl_ref, out_ref):
        si = pl.program_id(2)

        @pl.when(si == 0)
        def _():
            out_ref[...] = jnp.zeros_like(out_ref)

        tile = pl.program_id(1) * n_inner + si          # global spatial-tile index
        row_base = tile * ts

        if n_chunks == 1:
            loss = _chunk_loss(w_ref, pred_ref, lbl_ref, 0, row_base)
            acc = loss.reshape(chunk // _SUB, _SUB, _LANES).sum(axis=0)
        else:
            def body(i, acc):
                r0 = pl.multiple_of(i * chunk, chunk)
                loss = _chunk_loss(w_ref, pred_ref, lbl_ref, r0, row_base)
                return acc + loss.reshape(chunk // _SUB, _SUB, _LANES).sum(axis=0)

            # Rolled loop (not a static Python for) bounds vreg live ranges to one chunk.
            acc = lax.fori_loop(0, n_chunks, body,
                                jnp.zeros((_SUB, _LANES), jnp.float32))

        out_ref[...] += acc[None, None]

    return kernel


def weighted_soft_xent(predictions: jax.Array, labels: jax.Array, weights: jax.Array,
                       *, cast_logits_to_bf16: bool = True) -> jax.Array:
    """mean_{n,h,w}[ w[y] * (logsumexp(pred) - pred[y]) ] via a tiled Pallas kernel.

    predictions: (N, C, H, W) float logits.
    labels     : (N, H, W) integer class indices in [0, C).
    weights    : (C,) per-class weights.
    """
    N, C, H, W = predictions.shape
    HW = H * W

    pred = predictions
    if cast_logits_to_bf16 and pred.dtype != jnp.bfloat16:
        # HBM-bound kernel: halving logit bytes is close to a 2x end-to-end win; the
        # kernel casts each chunk back to f32 before exp/log.
        pred = pred.astype(jnp.bfloat16)

    lbl_dtype = jnp.int8 if C <= 127 else jnp.int32     # -1 pad sentinel must survive
    lbl = labels.reshape(N, HW).astype(lbl_dtype)
    pred = pred.reshape(N, C, HW)

    # Pad the flattened spatial axis only to the 1024-element (8x128) boundary needed for
    # the (S, 128) reshape — never to a multiple of the tile size.  No copy at all when
    # HW % 1024 == 0 (the common segmentation case).
    hw_pad = _round_up(HW, _SUB * _LANES)
    if hw_pad != HW:
        pred = jnp.pad(pred, ((0, 0), (0, 0), (0, hw_pad - HW)))
        lbl = jnp.pad(lbl, ((0, 0), (0, hw_pad - HW)), constant_values=-1)
    S = hw_pad // _LANES                                 # spatial rows; multiple of 8
    pred = pred.reshape(N, C, S, _LANES)
    lbl = lbl.reshape(N, S, _LANES)

    # ---- spatial tile size: as large as the VMEM stream budget allows (no divisor hunt) ----
    row_bytes = _LANES * (C * pred.dtype.itemsize + lbl.dtype.itemsize)
    ts_cap = max(_CHUNK,
                 min(_MAX_TS, _round_down(_STREAM_BUDGET // (2 * row_bytes), _CHUNK)))
    if S <= _CHUNK:
        ts = S                                   # single small tile (full-extent block)
    elif S <= ts_cap and S % _CHUNK == 0:
        ts = S                                   # single tile, chunked inner loop
    else:
        ts = min(ts_cap, _round_down(S, _CHUNK))
    num_s = pl.cdiv(S, ts)                       # partial tail tile is masked in-kernel

    if ts % _CHUNK == 0 and ts > _CHUNK:
        chunk, n_chunks = _CHUNK, ts // _CHUNK
    else:
        chunk, n_chunks = ts, 1

    # v7x has two TensorCores: when N == 1, split the spatial tiles into an extra
    # 'parallel' axis so both cores get work (no effect on v5e/v6e).
    if N == 1 and num_s >= 2 and num_s % 2 == 0:
        n_outer = 2
    else:
        n_outer = 1
    n_inner = num_s // n_outer

    kernel = _make_wxent_kernel(C, ts, chunk, n_chunks, n_inner, S)

    partials = pl.pallas_call(
        kernel,
        out_shape=jax.ShapeDtypeStruct((N, n_outer, _SUB, _LANES), jnp.float32),
        grid_spec=pltpu.PrefetchScalarGridSpec(
            num_scalar_prefetch=1,                       # class weights live in SMEM
            grid=(N, n_outer, n_inner),                  # reduction (spatial) axis last
            in_specs=[
                pl.BlockSpec((1, C, ts, _LANES),
                             lambda n, so, si, w: (n, 0, so * n_inner + si, 0)),
                pl.BlockSpec((1, ts, _LANES),
                             lambda n, so, si, w: (n, so * n_inner + si, 0)),
            ],
            out_specs=pl.BlockSpec((1, 1, _SUB, _LANES),
                                   lambda n, so, si, w: (n, so, 0, 0)),
        ),
        compiler_params=pltpu.CompilerParams(
            dimension_semantics=("parallel", "parallel", "arbitrary"),
            vmem_limit_bytes=32 * 1024 * 1024,
        ),
    )(jnp.asarray(weights, jnp.float32), pred, lbl)

    return jnp.sum(partials) / (N * HW)


def _build_labels(targets, classes: int, dtype=jnp.int8) -> jax.Array:
    """Per-pixel class labels from the list of binary masks (allow_multiclass=False path).

    Equivalent to the module's stack([ones]+targets)[::-1] / argmax construction for
    {0,1}-valued masks (higher class index wins overlaps, background = 0), but streams
    each mask once instead of materializing an (N, classes+1, H, W) float stack."""
    base = jnp.squeeze(targets[0], axis=1)
    lbl = jnp.zeros(base.shape, dtype)
    for c, t in enumerate(targets, start=1):
        mask = jnp.squeeze(t, axis=1) > 0.5            # binary masks assumed (module contract)
        lbl = jnp.where(mask, jnp.array(c, dtype=dtype), lbl)
    return lbl


def example_segmentation_loss(predictions, targets, *, classes, weights=None,
                              on_the_fly_background=True, allow_multiclass=False,
                              cast_logits_to_bf16=True):
    """JAX/Pallas port of ExampleSegmentationLoss.forward (returns the XE term only,
    exactly like the PyTorch module — DICE is disabled by default and never computed)."""
    nc = classes + 1 if on_the_fly_background else classes
    if nc != predictions.shape[1]:
        raise ValueError(
            f"The amount of de facto used classes ({nc}) must be equal to the number of "
            f"provided predictions ({predictions.shape[1]}).")
    if allow_multiclass:
        # TODO(synk): allow_multiclass=True branch (hstack of background/targets[0]/targets[1])
        # is non-default and not ported.
        raise NotImplementedError("allow_multiclass=True path is not implemented")
    if weights is None:
        weights = jnp.ones((nc,), jnp.float32)
    lbl_dtype = jnp.int8 if nc <= 127 else jnp.int32
    labels = _build_labels(targets, classes, lbl_dtype)
    # nn.CrossEntropyLoss's ignore_index=-1 is inert for one-hot targets; in-kernel the
    # -1 sentinel only marks padded pixels.
    return weighted_soft_xent(predictions, labels, weights,
                              cast_logits_to_bf16=cast_logits_to_bf16)


def _example_segmentation_loss_ref(predictions, targets, weights, classes,
                                   on_the_fly_background=True):
    """Pure-JAX mirror of the PyTorch module (stack/argmax labels + weighted CE, mean)."""
    nc = classes + 1 if on_the_fly_background else classes
    ones = jnp.ones_like(targets[0])
    stacked = jnp.stack(([ones] + list(targets))[::-1], axis=1)      # (N, nc, 1, H, W)
    labels = jnp.squeeze(classes - jnp.argmax(stacked, axis=1), axis=1)
    oh = jax.nn.one_hot(labels, nc, dtype=jnp.float32)               # (N, H, W, nc)
    oh = jnp.moveaxis(oh, -1, 1)                                     # (N, nc, H, W)
    logp = jax.nn.log_softmax(predictions.astype(jnp.float32), axis=1)
    w = jnp.asarray(weights, jnp.float32).reshape(1, nc, 1, 1)
    per_pixel = -jnp.sum(w * oh * logp, axis=1)                      # (N, H, W)
    return jnp.mean(per_pixel)                                       # mean over N*H*W


if __name__ == "__main__":
    key = jax.random.PRNGKey(0)

    def make_case(k, n, classes, h, w):
        nc = classes + 1
        keys = jax.random.split(k, classes + 2)
        preds = jax.random.normal(keys[0], (n, nc, h, w), dtype=jnp.float32)
        tgts = [(jax.random.uniform(kk, (n, 1, h, w)) < 0.35).astype(jnp.float32)
                for kk in keys[1:classes + 1]]
        wts = 0.5 + jax.random.uniform(keys[classes + 1], (nc,), dtype=jnp.float32)
        return preds, tgts, wts

    k1, k2 = jax.random.split(key)

    # Case 1: small module-typical shape (single-tile path). Check f32 (tight) and the
    # default bf16-logit path (loose tolerance), addressing the bf16 test concern.
    preds, targets, weights = make_case(k1, 2, 3, 16, 16)
    ref = _example_segmentation_loss_ref(preds, targets, weights, 3)

    out_f32 = example_segmentation_loss(preds, targets, classes=3, weights=weights,
                                        cast_logits_to_bf16=False)
    out_f32 = jax.block_until_ready(out_f32)
    assert jnp.allclose(out_f32, ref, atol=1e-5, rtol=1e-5), (out_f32, ref)

    out_bf16 = example_segmentation_loss(preds, targets, classes=3, weights=weights)
    out_bf16 = jax.block_until_ready(out_bf16)
    assert jnp.allclose(out_bf16, ref, atol=3e-2, rtol=3e-2), (out_bf16, ref)

    # Case 2: non-1024-aligned spatial size with N=1 — exercises the chunked inner loop,
    # the masked partial tail tile and the dual-TensorCore spatial split.
    preds2, targets2, weights2 = make_case(k2, 1, 3, 136, 136)
    ref2 = _example_segmentation_loss_ref(preds2, targets2, weights2, 3)
    out2 = example_segmentation_loss(preds2, targets2, classes=3, weights=weights2)
    out2 = jax.block_until_ready(out2)
    assert jnp.allclose(out2, ref2, atol=3e-2, rtol=3e-2), (out2, ref2)

    print("KERNEL_OK")
</pallas_src>

<mosaic_0001>
module attributes {stable_mosaic.version = 11 : i64} {
  func.func @kernel(%arg0: i32, %arg1: i32, %arg2: i32, %arg3: memref<4xf32, #tpu.memory_space<smem>>, %arg4: memref<1x4x8x128xf32, #tpu.memory_space<vmem>>, %arg5: memref<1x8x128xi8, #tpu.memory_space<vmem>>, %arg6: memref<1x1x8x128xf32, #tpu.memory_space<vmem>>) attributes {dimension_semantics = [#tpu.dimension_semantics<parallel>, #tpu.dimension_semantics<parallel>, #tpu.dimension_semantics<arbitrary>], iteration_bounds = array<i64: 2, 1, 1>, scalar_prefetch = 1 : i64, scratch_operands = 0 : i64, tpu.core_type = #tpu.core_type<tc>, window_params = [{transform_indices = @transform_0, window_bounds = array<i64: 1, 4, 8, 128>}, {transform_indices = @transform_1, window_bounds = array<i64: 1, 8, 128>}, {transform_indices = @transform_2, window_bounds = array<i64: 1, 1, 8, 128>}]} {
    %c0_i32 = arith.constant 0 : i32
    %0 = arith.cmpi eq, %arg2, %c0_i32 : i32
    %1 = arith.extui %0 : i1 to i32
    %c0_i32_0 = arith.constant 0 : i32
    %2 = arith.cmpi ne, %1, %c0_i32_0 : i32
    scf.if %2 {
      %cst_53 = arith.constant 0.000000e+00 : f32
      %88 = vector.broadcast %cst_53 : f32 to vector<1x1x8x128xf32>
      %c0_54 = arith.constant 0 : index
      %c0_55 = arith.constant 0 : index
      %c0_56 = arith.constant 0 : index
      %c0_57 = arith.constant 0 : index
      %89 = vector.load %arg6[%c0_54, %c0_55, %c0_56, %c0_57] : memref<1x1x8x128xf32, #tpu.memory_space<vmem>>, vector<1x1x8x128xf32>
      tpu.vector_store %arg6[%c0_54, %c0_55, %c0_56, %c0_57], %88 {strides = array<i32>} : memref<1x1x8x128xf32, #tpu.memory_space<vmem>>, vector<1x1x8x128xf32>,
    } else {
    }
    %c1_i32 = arith.constant 1 : i32
    %3 = arith.muli %arg1, %c1_i32 : i32
    %4 = arith.addi %3, %arg2 : i32
    %c8_i32 = arith.constant 8 : i32
    %5 = arith.muli %4, %c8_i32 : i32
    %c0 = arith.constant 0 : index
    %c0_1 = arith.constant 0 : index
    %c0_2 = arith.constant 0 : index
    %6 = vector.load %arg5[%c0, %c0_1, %c0_2] : memref<1x8x128xi8, #tpu.memory_space<vmem>>, vector<1x8x128xi8>
    %7 = vector.shape_cast %6 : vector<1x8x128xi8> to vector<8x128xi8>
    %8 = arith.extsi %7 : vector<8x128xi8> to vector<8x128xi32>
    %c0_3 = arith.constant 0 : index
    %c0_4 = arith.constant 0 : index
    %c0_5 = arith.constant 0 : index
    %c0_6 = arith.constant 0 : index
    %9 = vector.load %arg4[%c0_3, %c0_4, %c0_5, %c0_6] : memref<1x4x8x128xf32, #tpu.memory_space<vmem>>, vector<1x1x8x128xf32>
    %10 = vector.shape_cast %9 : vector<1x1x8x128xf32> to vector<8x128xf32>
    %c0_7 = arith.constant 0 : index
    %c1 = arith.constant 1 : index
    %c0_8 = arith.constant 0 : index
    %c0_9 = arith.constant 0 : index
    %11 = vector.load %arg4[%c0_7, %c1, %c0_8, %c0_9] : memref<1x4x8x128xf32, #tpu.memory_space<vmem>>, vector<1x1x8x128xf32>
    %12 = vector.shape_cast %11 : vector<1x1x8x128xf32> to vector<8x128xf32>
    %13 = arith.maximumf %10, %12 : vector<8x128xf32>
    %c0_10 = arith.constant 0 : index
    %c2 = arith.constant 2 : index
    %c0_11 = arith.constant 0 : index
    %c0_12 = arith.constant 0 : index
    %14 = vector.load %arg4[%c0_10, %c2, %c0_11, %c0_12] : memref<1x4x8x128xf32, #tpu.memory_space<vmem>>, vector<1x1x8x128xf32>
    %15 = vector.shape_cast %14 : vector<1x1x8x128xf32> to vector<8x128xf32>
    %16 = arith.maximumf %13, %15 : vector<8x128xf32>
    %c0_13 = arith.constant 0 : index
    %c3 = arith.constant 3 : index
    %c0_14 = arith.constant 0 : index
    %c0_15 = arith.constant 0 : index
    %17 = vector.load %arg4[%c0_13, %c3, %c0_14, %c0_15] : memref<1x4x8x128xf32, #tpu.memory_space<vmem>>, vector<1x1x8x128xf32>
    %18 = vector.shape_cast %17 : vector<1x1x8x128xf32> to vector<8x128xf32>
    %19 = arith.maximumf %16, %18 : vector<8x128xf32>
    %cst = arith.constant 0.000000e+00 : f32
    %20 = vector.broadcast %cst : f32 to vector<8x128xf32>
    %cst_16 = arith.constant 0.000000e+00 : f32
    %21 = vector.broadcast %cst_16 : f32 to vector<8x128xf32>
    %cst_17 = arith.constant 0.000000e+00 : f32
    %22 = vector.broadcast %cst_17 : f32 to vector<8x128xf32>
    %c0_18 = arith.constant 0 : index
    %c0_19 = arith.constant 0 : index
    %c0_20 = arith.constant 0 : index
    %c0_21 = arith.constant 0 : index
    %23 = vector.load %arg4[%c0_18, %c0_19, %c0_20, %c0_21] : memref<1x4x8x128xf32, #tpu.memory_space<vmem>>, vector<1x1x8x128xf32>
    %24 = vector.shape_cast %23 : vector<1x1x8x128xf32> to vector<8x128xf32>
    %25 = arith.subf %24, %19 : vector<8x128xf32>
    %26 = math.exp %25 : vector<8x128xf32>
    %27 = arith.addf %20, %26 : vector<8x128xf32>
    %c0_i32_22 = arith.constant 0 : i32
    %28 = vector.broadcast %c0_i32_22 : i32 to vector<8x128xi32>
    %29 = arith.cmpi eq, %8, %28 : vector<8x128xi32>
    %30 = arith.select %29, %24, %21 : vector<8x128xi1>, vector<8x128xf32>
    %c0_23 = arith.constant 0 : index
    %31 = memref.load %arg3[%c0_23] : memref<4xf32, #tpu.memory_space<smem>>
    %32 = vector.broadcast %31 : f32 to vector<8x128xf32>
    %33 = arith.select %29, %32, %22 : vector<8x128xi1>, vector<8x128xf32>
    %c0_24 = arith.constant 0 : index
    %c1_25 = arith.constant 1 : index
    %c0_26 = arith.constant 0 : index
    %c0_27 = arith.constant 0 : index
    %34 = vector.load %arg4[%c0_24, %c1_25, %c0_26, %c0_27] : memref<1x4x8x128xf32, #tpu.memory_space<vmem>>, vector<1x1x8x128xf32>
    %35 = vector.shape_cast %34 : vector<1x1x8x128xf32> to vector<8x128xf32>
    %36 = arith.subf %35, %19 : vector<8x128xf32>
    %37 = math.exp %36 : vector<8x128xf32>
    %38 = arith.addf %27, %37 : vector<8x128xf32>
    %c1_i32_28 = arith.constant 1 : i32
    %39 = vector.broadcast %c1_i32_28 : i32 to vector<8x128xi32>
    %40 = arith.cmpi eq, %8, %39 : vector<8x128xi32>
    %41 = arith.select %40, %35, %30 : vector<8x128xi1>, vector<8x128xf32>
    %c1_29 = arith.constant 1 : index
    %42 = memref.load %arg3[%c1_29] : memref<4xf32, #tpu.memory_space<smem>>
    %43 = vector.broadcast %42 : f32 to vector<8x128xf32>
    %44 = arith.select %40, %43, %33 : vector<8x128xi1>, vector<8x128xf32>
    %c0_30 = arith.constant 0 : index
    %c2_31 = arith.constant 2 : index
    %c0_32 = arith.constant 0 : index
    %c0_33 = arith.constant 0 : index
    %45 = vector.load %arg4[%c0_30, %c2_31, %c0_32, %c0_33] : memref<1x4x8x128xf32, #tpu.memory_space<vmem>>, vector<1x1x8x128xf32>
    %46 = vector.shape_cast %45 : vector<1x1x8x128xf32> to vector<8x128xf32>
    %47 = arith.subf %46, %19 : vector<8x128xf32>
    %48 = math.exp %47 : vector<8x128xf32>
    %49 = arith.addf %38, %48 : vector<8x128xf32>
    %c2_i32 = arith.constant 2 : i32
    %50 = vector.broadcast %c2_i32 : i32 to vector<8x128xi32>
    %51 = arith.cmpi eq, %8, %50 : vector<8x128xi32>
    %52 = arith.select %51, %46, %41 : vector<8x128xi1>, vector<8x128xf32>
    %c2_34 = arith.constant 2 : index
    %53 = memref.load %arg3[%c2_34] : memref<4xf32, #tpu.memory_space<smem>>
    %54 = vector.broadcast %53 : f32 to vector<8x128xf32>
    %55 = arith.select %51, %54, %44 : vector<8x128xi1>, vector<8x128xf32>
    %c0_35 = arith.constant 0 : index
    %c3_36 = arith.constant 3 : index
    %c0_37 = arith.constant 0 : index
    %c0_38 = arith.constant 0 : index
    %56 = vector.load %arg4[%c0_35, %c3_36, %c0_37, %c0_38] : memref<1x4x8x128xf32, #tpu.memory_space<vmem>>, vector<1x1x8x128xf32>
    %57 = vector.shape_cast %56 : vector<1x1x8x128xf32> to vector<8x128xf32>
    %58 = arith.subf %57, %19 : vector<8x128xf32>
    %59 = math.exp %58 : vector<8x128xf32>
    %60 = arith.addf %49, %59 : vector<8x128xf32>
    %c3_i32 = arith.constant 3 : i32
    %61 = vector.broadcast %c3_i32 : i32 to vector<8x128xi32>
    %62 = arith.cmpi eq, %8, %61 : vector<8x128xi32>
    %63 = arith.select %62, %57, %52 : vector<8x128xi1>, vector<8x128xf32>
    %c3_39 = arith.constant 3 : index
    %64 = memref.load %arg3[%c3_39] : memref<4xf32, #tpu.memory_space<smem>>
    %65 = vector.broadcast %64 : f32 to vector<8x128xf32>
    %66 = arith.select %62, %65, %55 : vector<8x128xi1>, vector<8x128xf32>
    %67 = math.log %60 : vector<8x128xf32>
    %68 = arith.addf %19, %67 : vector<8x128xf32>
    %c0_i32_40 = arith.constant 0 : i32
    %69 = arith.addi %5, %c0_i32_40 : i32
    %70 = tpu.iota {dimensions = array<i32: 0>} : vector<8x128xi32>
    %71 = vector.broadcast %69 : i32 to vector<8x128xi32>
    %72 = arith.addi %71, %70 : vector<8x128xi32>
    %c8_i32_41 = arith.constant 8 : i32
    %73 = vector.broadcast %c8_i32_41 : i32 to vector<8x128xi32>
    %74 = arith.cmpi slt, %72, %73 : vector<8x128xi32>
    %c0_i32_42 = arith.constant 0 : i32
    %75 = vector.broadcast %c0_i32_42 : i32 to vector<8x128xi32>
    %76 = arith.cmpi sge, %8, %75 : vector<8x128xi32>
    %77 = arith.andi %74, %76 : vector<8x128xi1>
    %78 = arith.subf %68, %63 : vector<8x128xf32>
    %79 = arith.mulf %66, %78 : vector<8x128xf32>
    %cst_43 = arith.constant 0.000000e+00 : f32
    %80 = vector.broadcast %cst_43 : f32 to vector<8x128xf32>
    %81 = arith.select %77, %79, %80 : vector<8x128xi1>, vector<8x128xf32>
    %82 = vector.shape_cast %81 : vector<8x128xf32> to vector<1x8x128xf32>
    %cst_44 = arith.constant dense<0.000000e+00> : vector<8x128xf32>
    %83 = vector.multi_reduction <add>, %82, %cst_44 [0] : vector<1x8x128xf32> to vector<8x128xf32>
    %c0_45 = arith.constant 0 : index
    %c0_46 = arith.constant 0 : index
    %c0_47 = arith.constant 0 : index
    %c0_48 = arith.constant 0 : index
    %84 = vector.load %arg6[%c0_45, %c0_46, %c0_47, %c0_48] : memref<1x1x8x128xf32, #tpu.memory_space<vmem>>, vector<1x1x8x128xf32>
    %85 = vector.shape_cast %83 : vector<8x128xf32> to vector<1x1x8x128xf32>
    %86 = arith.addf %84, %85 : vector<1x1x8x128xf32>
    %c0_49 = arith.constant 0 : index
    %c0_50 = arith.constant 0 : index
    %c0_51 = arith.constant 0 : index
    %c0_52 = arith.constant 0 : index
    %87 = vector.load %arg6[%c0_49, %c0_50, %c0_51, %c0_52] : memref<1x1x8x128xf32, #tpu.memory_space<vmem>>, vector<1x1x8x128xf32>
    tpu.vector_store %arg6[%c0_49, %c0_50, %c0_51, %c0_52], %86 {strides = array<i32>} : memref<1x1x8x128xf32, #tpu.memory_space<vmem>>, vector<1x1x8x128xf32>,
    return
  }
  func.func @transform_0(%arg0: i32, %arg1: i32, %arg2: i32, %arg3: memref<4xf32, #tpu.memory_space<smem>>) -> (i32, i32, i32, i32) {
    %c1_i32 = arith.constant 1 : i32
    %0 = arith.muli %arg1, %c1_i32 : i32
    %1 = arith.addi %0, %arg2 : i32
    %c0_i32 = arith.constant 0 : i32
    %c0_i32_0 = arith.constant 0 : i32
    %c0_i32_1 = arith.constant 0 : i32
    return %arg0, %c0_i32, %1, %c0_i32_0 : i32, i32, i32, i32
  }
  func.func @transform_1(%arg0: i32, %arg1: i32, %arg2: i32, %arg3: memref<4xf32, #tpu.memory_space<smem>>) -> (i32, i32, i32) {
    %c1_i32 = arith.constant 1 : i32
    %0 = arith.muli %arg1, %c1_i32 : i32
    %1 = arith.addi %0, %arg2 : i32
    %c0_i32 = arith.constant 0 : i32
    %c0_i32_0 = arith.constant 0 : i32
    return %arg0, %1, %c0_i32 : i32, i32, i32
  }
  func.func @transform_2(%arg0: i32, %arg1: i32, %arg2: i32, %arg3: memref<4xf32, #tpu.memory_space<smem>>) -> (i32, i32, i32, i32) {
    %c0_i32 = arith.constant 0 : i32
    %c0_i32_0 = arith.constant 0 : i32
    %c0_i32_1 = arith.constant 0 : i32
    return %arg0, %arg1, %c0_i32, %c0_i32_0 : i32, i32, i32, i32
  }
}

</mosaic_0001>

<bundles_post_ra>
// kernel: tpu_custom_call.1
= control target key start
LH: loop header
LB: loop body
LE: loop exit
PB: predicated region body
PF: predicated region fallthrough
CT: control target
= control target key end

     0   :  { %s857_s0 = inlined_call_operand.hbm [shape: f32[4], index: 0, kind: input, shape index: {}]   ;;  %s858_s1 = inlined_call_operand.hbm [shape: f32[2,4,8,128], index: 1, kind: input, shape index: {}]   ;;  %s859_s2 = inlined_call_operand.vmem [shape: s8[2,8,128], index: 2, kind: input, shape index: {}]   ;;  %s860_s3 = inlined_call_operand.hbm [shape: f32[2,1,8,128], index: 3, kind: output, shape index: {}]  }
   0x1   :  { %s515_s14 = scalar_lea.hbm %s857_s0, 16 }
   0x2   :  { %p516_p0 = scmp.ne.s32.totalorder %s857_s0, %s515_s14  ;;  %p519_p1 = scmp.lt.u32.totalorder %s515_s14, %s857_s0 }
   0x4   :  { %p521_p2 = pnand %p519_p1, %p516_p0 }
   0x6   :  { %524 = shalt.err (!%p521_p2)  }
   0x7   :  { %s641_s19 = smov [#allocation3]  }
   0x8   :  { %9 = dma.hbm_to_smem %s857_s0, 16, %s641_s19, [#allocation2] }
   0x9   :  { %607 = dma.done.wait [#allocation2], 16 }
   0xa   :  { %608 = vsyncadd [#allocation2], 4294967280 }
   0xb   :  { %11 = sfence }
   0xc   :  { %12 = vsyncpa [#allocation5], 0 }
   0xd   :  { %14 = vsyncpa [#allocation5 + $0x1], 0 }
   0xe   :  { %15 = vsyncpa [#allocation6], 0 }
   0xf   :  { %17 = vsyncpa [#allocation6 + $0x1], 0  ;;  %s678_s22 = smov 0   ;;  %s680_s23 = smov 0  }
  0x10   :  { %s682_s24 = smov 0   ;;  %s684_s25 = smov 0  }
  0x11   :  { %s686_s26 = smov 0   ;;  %s688_s27 = smov 0  }
  0x12 LB: > { %s417_s0 = sadd.s32 4294967295, %s639_s27   ;;  %s418_s28 = sadd.s32 4294967294, %s639_s27   ;;  %s639_s27 = sphi %s688_s27, %s23_s27   ;;  %s635_s26 = sphi %s686_s26, %s875_s26   ;;  %s631_s25 = sphi %s684_s25, %s874_s25   ;;  %s627_s24 = sphi %s682_s24, %s873_s24   ;;  %s623_s23 = sphi %s680_s23, %s872_s23   ;;  %s619_s22 = sphi %s678_s22, %s871_s22  }
  0x13   : > { %s42_s29 = sadd.s32 1, %s635_s26  ;;  %s53_s30 = sadd.s32 1, %s627_s24 }
  0x14   : > { %p44_p3 = scmp.ge.s32.totalorder %s42_s29, 2  ;;  %p60_p4 = scmp.ne.s32.totalorder %s627_s24, %s623_s23 }
  0x15   : > { %p61_p5 = scmp.eq.s32.totalorder %s639_s27, 0  ;;  %p66_p6 = scmp.ne.s32.totalorder %s623_s23, %s619_s22 }
  0x16   : > { %s877_s29 = smov (%p44_p3, %s42_s29), 0  ;;  %p67_p8 = scmp.eq.s32.totalorder %s417_s0, 0 }
  0x17   : > { %p719_p7 = por %p61_p5, %p60_p4  ;;  %s48_s5 = ssub.s32 %s635_s26, %s877_s29 }
  0x18   : > { %p122_p9 = scmp.eq.s32.totalorder %s417_s0, 1  ;;  %p51_p10 = scmp.eq.s32.totalorder %s48_s5, 0 }
  0x19   : > { %p725_p11 = por %p67_p8, %p66_p6  ;;  %p128_p13 = scmp.eq.s32.totalorder %s418_s28, 1 }
  0x1a   : > { %p729_p12 = por %p122_p9, %p60_p4  ;;  %p451_p2 = scmp.lt.s32.totalorder %s639_s27, 2 }
  0x1b   : > { %s734_s8 = scalar_select %p51_p10, %s627_s24, %s53_s30  }
  0x1c   : > { %s864_s7 = scalar_select %p729_p12, 1, 0 }
  0x1d   : > { %p736_p0 = por %p128_p13, %p66_p6  ;;  %s148_s10 = sand.u32 1, %s627_s24  }
  0x1e   : > { %s421_s11 = sshll.u32 %s148_s10, 5  ;;  %s438_s12 = sshll.u32 %s635_s26, 9 }
  0x1f   : > { %s865_s9 = scalar_select %p736_p0, 1, 0 }
  0x20   : > { %s747_s15 = scalar_lea.hbm %s858_s1, %s438_s12  ;;  %s152_s16 = scalar_lea.vmem [#allocation4], %s421_s11 }
  0x21   : > { %s161_s17 = sshll.u32 %s152_s16, 4  ;;  %p753_p3 = pnand %p451_p2, %p719_p7  ;;  %s749_s17 = int_to_ptr.vmem [resolvable:$true] %s161_s17 }
  0x22   : > { %s758_s19 = scalar_lea.sflag [#allocation5], %s148_s10  ;;  %s525_s20 = scalar_lea.hbm %s747_s15, 512 }
  0x23   : > { %p526_p5 = scmp.ne.s32.totalorder %s747_s15, %s525_s20  ;;  %p527_p6 = pneg %p753_p3 }
  0x24   : > { %s530_s28 = scalar_lea.hbm %s858_s1, 1024  ;;  %p531_p7 = scmp.lt.u32.totalorder %s747_s15, %s858_s1 }
  0x25   : > { %p528_p8 = pnand %p527_p6, %p526_p5  ;;  %p532_p10 = scmp.lt.u32.totalorder %s530_s28, %s525_s20 }
  0x26   : > { %p534_p2 = scmp.lt.u32.totalorder %s525_s20, %s747_s15 }
  0x27   : > { %p529_p9 = pneg %p528_p8  ;;  %p533_p13 = por %p532_p10, %p531_p7 }
  0x29   : > { %p535_p1 = por %p534_p2, %p533_p13 }
  0x2b   : > { %p536_p4 = pnand %p535_p1, %p529_p9 }
  0x2d   : > { %539 = shalt.err (!%p536_p4)
}
  0x2e   : > { %s540_s5 = scalar_lea.vmem %s749_s17, 512  ;;  %s642_s10 = smov [#allocation4]  }
  0x2f   : > { %p541_p5 = scmp.ne.s32.totalorder %s749_s17, %s540_s5  ;;  %s545_s11 = sshll.u32 %s642_s10, 4  ;;  %s546_s11 = int_to_ptr.vmem [resolvable:$false] %s545_s11 }
  0x30   : > { %s547_s12 = scalar_lea.vmem %s546_s11, 1024  ;;  %p548_p12 = scmp.lt.s32.totalorder %s749_s17, %s546_s11 }
  0x31   : > { %p543_p8 = pnand %p541_p5, %p527_p6  ;;  %p549_p7 = scmp.lt.s32.totalorder %s547_s12, %s540_s5 }
  0x33   : > { %p544_p0 = pneg %p543_p8  ;;  %p550_p10 = por %p549_p7, %p548_p12 }
  0x35   : > { %p551_p13 = pnand %p550_p10, %p544_p0 }
  0x37   : > { %554 = shalt.err (!%p551_p13)
}
  0x38   : > { %s643_s13 = smov 128   ;;  %s644_s14 = smov 8  }
  0x39   : > { %446 = dma.hbm_to_vmem [thread:$0]  (!%p753_p3), %s747_s15, 512, %s749_s17, %s758_s19, %s643_s13, %s643_s13, %s644_s14  }
  0x3a   : > { %p181_p1 = scmp.lt.s32.totalorder %s639_s27, 3  ;;  %p867_p4 = scmp.ge.s32.totalorder %s639_s27, 1 }
  0x3c   : > { %p182_p6 = pnand %p867_p4, %p181_p1 }
  0x3d   : > { %s790_s16 = sand.u32 (!%p182_p6), 1, %s623_s23  }
  0x3e   : > { %185 = sbr.rel (%p182_p6) target bundleno = 133 (0x85), region = 28  ;;  %s425_s20 = sshll.u32 (!%p182_p6), %s790_s16, 5 }
  0x3f   : > { %s188_s21 = scalar_lea.sflag (!%p182_p6), [#allocation5], %s790_s16  ;;  %s191_s0 = scalar_lea.vmem (!%p182_p6), [#allocation4], %s425_s20 }
  0x45   : > { %610 = dma.done.wait (%p725_p11), %s188_s21, 512  }
  0x46   : > { %612 = vsyncadd (%p725_p11), %s188_s21, 4294966784  ;;  %v239_v0 = vld [vmem:[%s191_s0] sm:$0xff]  ;;  %v428_v1 = vld [vmem:[%s191_s0 + $0x8] sm:$0xff]  ;;  %p222_p12 = scmp.lt.s32.totalorder %s631_s25, 1  ;;  %s255_s28 = sld [smem:[#allocation3]] }
  0x47   : > { %v242_v2 = vmax.f32 %v239_v0, %v428_v1  ;;  %v429_v3 = vld [vmem:[%s191_s0 + $0x10] sm:$0xff]  ;;  %v430_v4 = vld [vmem:[%s191_s0 + $0x18] sm:$0xff]  ;;  %s431_s30 = sld [smem:[#allocation3 + $0x1]]  ;;  %s432_s4 = sld [smem:[#allocation3 + $0x2]] }
  0x48   : > { %s223_s6 = scalar_select %p222_p12, %s631_s25, 1 }
  0x49   : > { %v245_v5 = vmax.f32 %v242_v2, %v429_v3  ;;  %s433_s5 = sld [smem:[#allocation3 + $0x3]]  ;;  %s426_s10 = sshll.u32 %s790_s16, 3 }
  0x4a   : > { %s427_s15 = sshll.u32 %s223_s6, 1  ;;  %s435_s11 = sshll.u32 %s631_s25, 7 }
  0x4b   : > { %v248_v6 = vmax.f32 %v245_v5, %v430_v4  ;;  %s228_s19 = scalar_lea.vmem %s859_s2, %s427_s15  ;;  %s219_s12 = scalar_lea.vmem [#allocation7], %s426_s10 }
  0x4c   : > { %v237_v17 = vld [vmem:[%s228_s19] sm:$0x3]  ;;  %v256_v24 = vstv %s255_s28  ;;  %s317_s13 = sshll.u32 %s219_s12, 4  ;;  %s808_s21 = scalar_lea.hbm %s860_s3, %s435_s11  ;;  %s810_s13 = int_to_ptr.vmem [resolvable:$true] %s317_s13 }
  0x4d   : > { %v249_v7 = vsub.f32 %v239_v0, %v248_v6  ;;  %v258_v8 = vsub.f32 %v428_v1, %v248_v6  ;;  %v267_v9 = vsub.f32 %v429_v3, %v248_v6  ;;  %v276_v10 = vsub.f32 %v430_v4, %v248_v6  ;;  %s303_s0 = scalar_lea.sflag [#allocation6], %s790_s16  ;;  %s555_s6 = scalar_lea.vmem %s810_s13, 128 }
  0x4e   : > { %v238_v21 = vunpack.c.0.s8 %v237_v17  ;;  %v265_v27 = vstv %s431_s30  ;;  %v274_v30 = vstv %s432_s4  ;;  %p556_p11 = scmp.ne.s32.totalorder %s810_s13, %s555_s6  ;;  %p868_p0 = scmp.ne.s32.totalorder %s864_s7, 0 }
  0x4f   : > { %v250_v11 = vmul.f32 1.442695, %v249_v7  ;;  %v259_v12 = vmul.f32 1.442695, %v258_v8  ;;  %v268_v13 = vmul.f32 1.442695, %v267_v9  ;;  %v283_v34 = vstv %s433_s5 }
  0x50   : > { %v277_v14 = vmul.f32 1.442695, %v276_v10  ;;  %vm253_vm0 = vcmp.eq.s32.totalorder %v238_v21, 0  ;;  %vm262_vm1 = vcmp.eq.s32.totalorder %v238_v21, 1  ;;  %vm271_vm2 = vcmp.eq.s32.totalorder %v238_v21, 2  ;;  %p557_p3 = pnand %p556_p11, %p868_p0  ;;  %s645_s25 = smov [#allocation7]  }
  0x51   : > { %505 = vpow2.f32 %v250_v11  ;;  %v254_v25 = vsel %vm253_vm0, %v239_v0, 0.0  ;;  %v257_v26 = vsel %vm253_vm0, %v256_v24, 0.0  ;;  %vm280_vm3 = vcmp.eq.s32.totalorder %v238_v21, 3  ;;  %s559_s15 = sshll.u32 %s645_s25, 4  ;;  %s560_s15 = int_to_ptr.vmem [resolvable:$false] %s559_s15 }
  0x52   : > { %507 = vpow2.f32 %v259_v12  ;;  %v263_v28 = vsel %vm262_vm1, %v428_v1, %v254_v25  ;;  %v266_v29 = vsel %vm262_vm1, %v265_v27, %v257_v26  ;;  %vm293_vm4 = vcmp.ge.s32.totalorder %v238_v21, 0  ;;  %p558_p9 = pneg %p557_p3  ;;  %s561_s17 = scalar_lea.vmem %s560_s15, 256 }
  0x53   : > { %509 = vpow2.f32 %v268_v13  ;;  %v272_v31 = vsel %vm271_vm2, %v429_v3, %v263_v28  ;;  %v275_v33 = vsel %vm271_vm2, %v274_v30, %v266_v29  ;;  %p562_p2 = scmp.lt.s32.totalorder %s810_s13, %s560_s15  ;;  %p563_p5 = scmp.lt.s32.totalorder %s561_s17, %s555_s6 }
  0x54   : > { %511 = vpow2.f32 %v277_v14  ;;  %v281_v36 = vsel %vm280_vm3, %v430_v4, %v272_v31  ;;  %v284_v38 = vsel %vm280_vm3, %v283_v34, %v275_v33 }
  0x55   : > { %p564_p8 = por %p563_p5, %p562_p2 }
  0x57   : > { %p565_p7 = pnand %p564_p8, %p558_p9 }
  0x5b   : > { %v506_v15 = vpop.eup %505 }
  0x5c   : > { %v508_v16 = vpop.eup %507 }
  0x5d   : > { %v510_v18 = vpop.eup %509  ;;  %v261_v19 = vadd.f32 %v508_v16, %v506_v15 }
  0x5e   : > { %v512_v20 = vpop.eup %511 }
  0x5f   : > { %v270_v22 = vadd.f32 %v510_v18, %v261_v19 }
  0x61   : > { %v279_v23 = vadd.f32 %v512_v20, %v270_v22 }
  0x63   : > { %513 = vlog2.f32 %v279_v23 }
  0x6d   : > { %v514_v32 = vpop.eup %513 }
  0x6e   : > { %v286_v35 = vmul.f32 0.6931472, %v514_v32 }
  0x70   : > { %v287_v37 = vadd.f32 %v286_v35, %v248_v6 }
  0x72   : > { %v295_v39 = vsub.f32 %v287_v37, %v281_v36 }
  0x74   : > { %v296_v40 = vmul.f32 %v295_v39, %v284_v38 }
  0x76   : > { %v297_v41 = vsel %vm293_vm4, %v296_v40, 0.0 }
  0x77   : > { %301 = vst [vmem:[%s219_s12] sm:$0xff] %v297_v41 }
  0x78   : > { %568 = shalt.err (!%p565_p7)
}
  0x79   : > { %s569_s16 = scalar_lea.hbm %s808_s21, 128  ;;  %s573_s28 = scalar_lea.hbm %s860_s3, 256 }
  0x7a   : > { %p570_p10 = scmp.ne.s32.totalorder %s808_s21, %s569_s16  ;;  %p574_p4 = scmp.lt.u32.totalorder %s808_s21, %s860_s3 }
  0x7b   : > { %p575_p6 = scmp.lt.u32.totalorder %s573_s28, %s569_s16  ;;  %p577_p11 = scmp.lt.u32.totalorder %s569_s16, %s808_s21 }
  0x7c   : > { %p571_p13 = pnand %p570_p10, %p868_p0 }
  0x7d   : > { %p576_p12 = por %p575_p6, %p574_p4 }
  0x7e   : > { %p572_p1 = pneg %p571_p13 }
  0x7f   : > { %p578_p3 = por %p577_p11, %p576_p12 }
  0x81   : > { %p579_p9 = pnand %p578_p3, %p572_p1 }
  0x83   : > { %582 = shalt.err (!%p579_p9)
}
  0x84   : > { %441 = dma.vmem_to_hbm [thread:$0]  (%p868_p0), %s810_s13, 128, %s808_s21, %s303_s0  }
  0x85 PF: > { %s329_s5 = sand.u32 1, %s619_s22   ;;  %p869_p2 = scmp.ne.s32.totalorder %s865_s9, 0 }
  0x86   : > { %p870_p5 = scmp.ge.s32.totalorder %s639_s27, 2  ;;  %s330_s10 = scalar_lea.sflag [#allocation6], %s329_s5 }
  0x88   : > { %p448_p8 = pnand %p870_p5, %p869_p2 }
  0x8a   : > { %614 = dma.done.wait (!%p448_p8), %s330_s10, 128  }
  0x8b   : > { %616 = vsyncadd (!%p448_p8), %s330_s10, 4294967168  ;;  %s23_s27 = sadd.s32 1, %s639_s27   ;;  %s871_s22 = smov %s623_s23 }
  0x8c   : > { %p20_p7 = scmp.ge.s32.totalorder %s23_s27, 4   ;;  %s872_s23 = smov %s627_s24 }
  0x8d   : > { %s873_s24 = smov %s734_s8  ;;  %s874_s25 = smov %s635_s26 }
  0x8e   : > { %s875_s26 = smov %s877_s29  ;;  %22 = sbr.rel (!%p20_p7) target bundleno = 18 (0x12), region = 83 }
  0x95   :  { %335 = vsyncpa [#allocation5], 1 }
  0x96   :  { %337 = vsyncpa [#allocation5 + $0x1], 1 }
  0x97   :  { %338 = vsyncpa [#allocation6], 1 }
  0x98   :  { %340 = vsyncpa [#allocation6 + $0x1], 1 }

</bundles_post_ra>
